<compile_context>
chip_gen: v5e
topology: v5e:2x2
jax: 0.10.0
libtpu: 0.0.40
codegen_flags: <defaults>
</compile_context>

<pallas_src>
import functools

import jax
import jax.numpy as jnp
from jax.experimental import pallas as pl
from jax.experimental.pallas import tpu as pltpu

_LANE = 128
_SUBLANE = 8


def _round_up(x, m):
    return ((x + m - 1) // m) * m


# ---------------------------------------------------------------------------
# Main kernel: a block of whole, independent image planes (planes x H*W).
# ---------------------------------------------------------------------------
def _simam_kernel(x_ref, o_ref, *, four_over_n, four_eps, inv_hw):
    x = x_ref[...].astype(jnp.float32)

    # Two-pass variance (mean first) — matches the PyTorch reference and avoids
    # sum(x^2) - mu*sum(x) cancellation.  The block is VMEM resident, so the
    # extra elementwise pass costs no HBM traffic.
    mu = jnp.sum(x, axis=1, keepdims=True) * inv_hw
    d = x - mu
    d2 = d * d
    s = jnp.sum(d2, axis=1, keepdims=True)

    # att = d^2 / (4*(s/n + eps)) + 0.5 = d^2 * inv + 0.5, one per-plane
    # reciprocal instead of a per-element divide.
    inv = pl.reciprocal(s * four_over_n + four_eps, approx=False)
    att = d2 * inv + 0.5
    o_ref[...] = (x * jax.nn.sigmoid(att)).astype(o_ref.dtype)


# ---------------------------------------------------------------------------
# Large-plane fallback: grid over (plane tiles, H*W tiles).
# ---------------------------------------------------------------------------
def _simam_stats_kernel(x_ref, mu_ref, inv_ref, sum_sc, sq_sc, *,
                        hw, tile_hw, four_over_n, four_eps, inv_hw):
    j = pl.program_id(1)

    @pl.when(j == 0)
    def _():
        sum_sc[...] = jnp.zeros_like(sum_sc)
        sq_sc[...] = jnp.zeros_like(sq_sc)

    x = x_ref[...].astype(jnp.float32)
    if hw % tile_hw:
        # Mask pixel columns past the ragged end of the last H*W block; they
        # would otherwise poison the per-plane sums.
        col = jax.lax.broadcasted_iota(jnp.int32, x.shape, 1) + j * tile_hw
        x = jnp.where(col < hw, x, 0.0)

    sum_sc[...] += jnp.sum(x, axis=1, keepdims=True)
    sq_sc[...] += jnp.sum(x * x, axis=1, keepdims=True)

    @pl.when(j == pl.num_programs(1) - 1)
    def _():
        s1 = sum_sc[...]
        mu = s1 * inv_hw
        s = jnp.maximum(sq_sc[...] - mu * s1, 0.0)   # clamp against cancellation
        mu_ref[...] = mu
        inv_ref[...] = pl.reciprocal(s * four_over_n + four_eps, approx=False)


def _simam_apply_kernel(x_ref, mu_ref, inv_ref, o_ref):
    x = x_ref[...].astype(jnp.float32)
    d = x - mu_ref[...]
    att = (d * d) * inv_ref[...] + 0.5
    o_ref[...] = (x * jax.nn.sigmoid(att)).astype(o_ref.dtype)


# ---------------------------------------------------------------------------
# Planning helpers.
# ---------------------------------------------------------------------------
def _vmem_budget():
    """(vmem_limit_bytes, block_budget_bytes), generation aware (v7x: 64 MiB)."""
    try:
        cap = int(pltpu.get_tpu_info().vmem_capacity_bytes)
    except Exception:
        cap = 64 << 20  # conservative fallback: works on every generation
    vmem_limit = max(16 << 20, min(64 << 20, (cap * 3) // 4))   # 48 MiB on v7x, 64 on v5e/v6e
    budget = min(28 << 20, vmem_limit // 2)                     # 24 MiB on v7x, 28 on v5e/v6e
    return vmem_limit, budget


def _plan_plane_tile(planes, per_plane_bytes, budget_bytes, *,
                     unit=_SUBLANE, min_steps=4, cap=8192):
    """Largest plane tile (multiple of `unit`) that fits the budget, capped so
    the 1-D grid keeps >= min_steps steps when there is enough work."""
    if planes <= unit:
        return planes
    tile = (budget_bytes // max(per_plane_bytes, 1)) // unit * unit
    tile = max(unit, min(tile, cap, _round_up(planes, unit)))
    per_step = (planes // min_steps) // unit * unit
    if per_step >= unit:
        tile = min(tile, per_step)
    return tile


def _cost(planes, hw, itemsize):
    return pl.CostEstimate(
        flops=int(10 * planes * hw),
        transcendentals=int(planes * hw),
        bytes_accessed=int(2 * planes * hw * itemsize),
    )


def _simam_large_plane(x2d, planes, hw, dtype, itemsize, consts, budget, vmem_limit):
    """Two-kernel path for planes too large to hold whole in VMEM."""
    bytes_per_elem = 4 * itemsize + 16     # io double buffers + f32 temporaries
    tile_p = planes if planes <= _SUBLANE else min(_round_up(planes, _SUBLANE), 32)
    tile_hw = (budget // (tile_p * bytes_per_elem)) // _LANE * _LANE
    tile_hw = max(_LANE, min(tile_hw, (hw // _LANE) * _LANE))
    grid = (pl.cdiv(planes, tile_p), pl.cdiv(hw, tile_hw))

    stats_kernel = functools.partial(_simam_stats_kernel, hw=hw, tile_hw=tile_hw, **consts)
    mu, inv = pl.pallas_call(
        stats_kernel,
        out_shape=(jax.ShapeDtypeStruct((planes, 1), jnp.float32),
                   jax.ShapeDtypeStruct((planes, 1), jnp.float32)),
        grid_spec=pltpu.PrefetchScalarGridSpec(
            num_scalar_prefetch=0,
            grid=grid,
            in_specs=[pl.BlockSpec((tile_p, tile_hw), lambda i, j: (i, j))],
            out_specs=[pl.BlockSpec((tile_p, 1), lambda i, j: (i, 0)),
                       pl.BlockSpec((tile_p, 1), lambda i, j: (i, 0))],
            scratch_shapes=[pltpu.VMEM((tile_p, 1), jnp.float32),
                            pltpu.VMEM((tile_p, 1), jnp.float32)],
        ),
        compiler_params=pltpu.CompilerParams(
            dimension_semantics=("parallel", "arbitrary"),
            vmem_limit_bytes=vmem_limit,
        ),
        cost_estimate=pl.CostEstimate(flops=int(3 * planes * hw), transcendentals=0,
                                      bytes_accessed=int(planes * hw * itemsize)),
    )(x2d)

    out2d = pl.pallas_call(
        _simam_apply_kernel,
        out_shape=jax.ShapeDtypeStruct((planes, hw), dtype),
        grid_spec=pltpu.PrefetchScalarGridSpec(
            num_scalar_prefetch=0,
            grid=grid,
            in_specs=[pl.BlockSpec((tile_p, tile_hw), lambda i, j: (i, j)),
                      pl.BlockSpec((tile_p, 1), lambda i, j: (i, 0)),
                      pl.BlockSpec((tile_p, 1), lambda i, j: (i, 0))],
            out_specs=pl.BlockSpec((tile_p, tile_hw), lambda i, j: (i, j)),
        ),
        compiler_params=pltpu.CompilerParams(
            dimension_semantics=("parallel", "arbitrary"),
            vmem_limit_bytes=vmem_limit,
        ),
        cost_estimate=_cost(planes, hw, itemsize),
    )(x2d, mu, inv)
    return out2d


# ---------------------------------------------------------------------------
# Public entry point.
# ---------------------------------------------------------------------------
def simam_attention(x, epsilon=1e-4, max_block_bytes=None):
    """x: (B, C, H, W). Returns x * sigmoid(attention), same shape/dtype."""
    B, C, H, W = x.shape
    hw = H * W
    assert hw > 1, "SimAM requires H*W > 1 (n = H*W - 1 would be zero)"
    planes = B * C
    n = float(hw - 1)
    itemsize = jnp.dtype(x.dtype).itemsize

    vmem_limit, budget = _vmem_budget()
    if max_block_bytes is not None:
        budget = int(max_block_bytes)

    consts = dict(four_over_n=4.0 / n, four_eps=4.0 * epsilon, inv_hw=1.0 / hw)
    x2d = x.reshape(planes, hw)   # pure metadata reshape of contiguous dims, no copy

    # Resident VMEM per plane: lane-padded io double buffers (2x in + 2x out in
    # io dtype) plus ~4 live f32 temporaries inside the kernel.
    hw_pad = _round_up(hw, _LANE)
    per_plane_bytes = hw_pad * (4 * itemsize + 16)

    if per_plane_bytes * _SUBLANE > budget:
        # Plane too large for even an (8, H*W) block: tile H*W on a 2nd grid axis.
        out2d = _simam_large_plane(x2d, planes, hw, x.dtype, itemsize,
                                   consts, budget, vmem_limit)
        return out2d.reshape(B, C, H, W)

    tile = _plan_plane_tile(planes, per_plane_bytes, budget)
    kernel = functools.partial(_simam_kernel, **consts)
    out2d = pl.pallas_call(
        kernel,
        out_shape=jax.ShapeDtypeStruct((planes, hw), x.dtype),
        grid_spec=pltpu.PrefetchScalarGridSpec(
            num_scalar_prefetch=0,
            grid=(pl.cdiv(planes, tile),),
            in_specs=[pl.BlockSpec((tile, hw), lambda i: (i, 0))],
            out_specs=pl.BlockSpec((tile, hw), lambda i: (i, 0)),
        ),
        compiler_params=pltpu.CompilerParams(
            dimension_semantics=("parallel",),
            vmem_limit_bytes=vmem_limit,
        ),
        cost_estimate=_cost(planes, hw, itemsize),
    )(x2d)
    return out2d.reshape(B, C, H, W)


def simam_attention_ref(x, epsilon=1e-4):
    """Pure-JAX reference mirroring the PyTorch forward exactly."""
    n = x.shape[2] * x.shape[3] - 1
    mu = jnp.mean(x, axis=(2, 3), keepdims=True)
    d = (x - mu) ** 2
    att = d / (4 * (jnp.sum(d, axis=(2, 3), keepdims=True) / n + epsilon)) + 0.5
    return x * jax.nn.sigmoid(att)


if __name__ == "__main__":
    key = jax.random.PRNGKey(0)
    k1, k2 = jax.random.split(key)

    # 1) H*W multiple of 128 (lane-dense path).
    x1 = jax.random.normal(k1, (2, 4, 16, 16), dtype=jnp.float32)
    out1 = jax.block_until_ready(simam_attention(x1))
    ref1 = simam_attention_ref(x1)
    assert out1.shape == x1.shape and out1.dtype == x1.dtype
    assert jnp.allclose(out1, ref1, atol=1e-5, rtol=1e-5), "mismatch (hw % 128 == 0)"

    # 2) Small / odd spatial size (7x7): same single layout, no wrapper copies.
    x2 = jax.random.normal(k2, (2, 4, 7, 7), dtype=jnp.float32)
    out2 = jax.block_until_ready(simam_attention(x2))
    ref2 = simam_attention_ref(x2)
    assert out2.shape == x2.shape and out2.dtype == x2.dtype
    assert jnp.allclose(out2, ref2, atol=1e-5, rtol=1e-5), "mismatch (hw % 128 != 0)"

    # 3) Exercise the large-plane (H*W-tiled, two-kernel) fallback by forcing a
    #    tiny block budget on a small shape.
    out3 = jax.block_until_ready(simam_attention(x1, max_block_bytes=32 * 1024))
    assert out3.shape == x1.shape and out3.dtype == x1.dtype
    assert jnp.allclose(out3, ref1, atol=1e-4, rtol=1e-4), "mismatch (hw-tiled path)"

    print("KERNEL_OK")
</pallas_src>

<mosaic_0001>
module attributes {stable_mosaic.version = 11 : i64} {
  func.func @_simam_kernel(%arg0: i32, %arg1: memref<8x256xf32, #tpu.memory_space<vmem>>, %arg2: memref<8x256xf32, #tpu.memory_space<vmem>>) attributes {dimension_semantics = [#tpu.dimension_semantics<parallel>], iteration_bounds = array<i64: 1>, scalar_prefetch = 0 : i64, scratch_operands = 0 : i64, tpu.core_type = #tpu.core_type<tc>, window_params = [{transform_indices = @transform_0, window_bounds = array<i64: 8, 256>}, {transform_indices = @transform_1, window_bounds = array<i64: 8, 256>}]} {
    %c0 = arith.constant 0 : index
    %c0_0 = arith.constant 0 : index
    %0 = vector.load %arg1[%c0, %c0_0] : memref<8x256xf32, #tpu.memory_space<vmem>>, vector<8x256xf32>
    %cst = arith.constant dense<0.000000e+00> : vector<8xf32>
    %1 = vector.multi_reduction <add>, %0, %cst [1] : vector<8x256xf32> to vector<8xf32>
    %2 = vector.shape_cast %1 : vector<8xf32> to vector<8x1xf32>
    %cst_1 = arith.constant 3.906250e-03 : f32
    %3 = vector.broadcast %cst_1 : f32 to vector<8x1xf32>
    %4 = arith.mulf %2, %3 : vector<8x1xf32>
    %5 = vector.broadcast %4 : vector<8x1xf32> to vector<8x256xf32>
    %6 = arith.subf %0, %5 : vector<8x256xf32>
    %7 = arith.mulf %6, %6 : vector<8x256xf32>
    %cst_2 = arith.constant dense<0.000000e+00> : vector<8xf32>
    %8 = vector.multi_reduction <add>, %7, %cst_2 [1] : vector<8x256xf32> to vector<8xf32>
    %9 = vector.shape_cast %8 : vector<8xf32> to vector<8x1xf32>
    %cst_3 = arith.constant 0.0156862754 : f32
    %10 = vector.broadcast %cst_3 : f32 to vector<8x1xf32>
    %11 = arith.mulf %9, %10 : vector<8x1xf32>
    %cst_4 = arith.constant 4.000000e-04 : f32
    %12 = vector.broadcast %cst_4 : f32 to vector<8x1xf32>
    %13 = arith.addf %11, %12 : vector<8x1xf32>
    %14 = tpu.reciprocal %13 : vector<8x1xf32> -> vector<8x1xf32>
    %15 = vector.broadcast %14 : vector<8x1xf32> to vector<8x256xf32>
    %16 = arith.mulf %7, %15 : vector<8x256xf32>
    %cst_5 = arith.constant 5.000000e-01 : f32
    %17 = vector.broadcast %cst_5 : f32 to vector<8x256xf32>
    %18 = arith.addf %16, %17 : vector<8x256xf32>
    %19 = arith.negf %18 : vector<8x256xf32>
    %20 = math.exp %19 : vector<8x256xf32>
    %cst_6 = arith.constant 1.000000e+00 : f32
    %21 = vector.broadcast %cst_6 : f32 to vector<8x256xf32>
    %22 = arith.addf %21, %20 : vector<8x256xf32>
    %23 = arith.divf %21, %22 : vector<8x256xf32>
    %24 = arith.mulf %0, %23 : vector<8x256xf32>
    %c0_7 = arith.constant 0 : index
    %c0_8 = arith.constant 0 : index
    %25 = vector.load %arg2[%c0_7, %c0_8] : memref<8x256xf32, #tpu.memory_space<vmem>>, vector<8x256xf32>
    tpu.vector_store %arg2[%c0_7, %c0_8], %24 {strides = array<i32>} : memref<8x256xf32, #tpu.memory_space<vmem>>, vector<8x256xf32>,
    return
  }
  func.func @transform_0(%arg0: i32) -> (i32, i32) {
    %c0_i32 = arith.constant 0 : i32
    %c0_i32_0 = arith.constant 0 : i32
    return %arg0, %c0_i32 : i32, i32
  }
  func.func @transform_1(%arg0: i32) -> (i32, i32) {
    %c0_i32 = arith.constant 0 : i32
    %c0_i32_0 = arith.constant 0 : i32
    return %arg0, %c0_i32 : i32, i32
  }
}

</mosaic_0001>

<bundles_post_ra>
// kernel: tpu_custom_call.1
= control target key start
LH: loop header
LB: loop body
LE: loop exit
PB: predicated region body
PF: predicated region fallthrough
CT: control target
= control target key end

     0   :  { %6 = vsyncpa [#allocation3], 0  ;;  %s209_s0 = inlined_call_operand.hbm [shape: f32[8,256], index: 0, kind: input, shape index: {}]   ;;  %s210_s1 = inlined_call_operand.hbm [shape: f32[8,256], index: 1, kind: output, shape index: {}]  }
   0x1   :  { %7 = vsyncpa [#allocation4], 0  ;;  %s13_s8 = sshll.u32 %s209_s0, 4  ;;  %s181_s9 = smov [#allocation2]   ;;  %s14_s8 = int_to_ptr.hbm [resolvable:$true] %s13_s8 }
   0x2   :  { %s15_s10 = sshll.u32 %s181_s9, 4  ;;  %s16_s10 = int_to_ptr.vmem [resolvable:$true] %s15_s10 }
   0x3   :  { %18 = dma.hbm_to_vmem [thread:$0]  %s14_s8, 256, %s16_s10, [#allocation3]  }
   0x4   :  { %177 = dma.done.wait [#allocation3], 256  }
   0x5   :  { %178 = vsyncadd [#allocation3], 4294967040  ;;  %v196_v0 = vld [vmem:[#allocation2] sm:$0xff]  ;;  %v198_v1 = vld [vmem:[#allocation2 + $0x8] sm:$0xff]  ;;  %s182_s0 = smov [#allocation5]   ;;  %s105_s14 = sshll.u32 %s210_s1, 4  ;;  %s106_s14 = int_to_ptr.hbm [resolvable:$true] %s105_s14 }
   0x6   :  { %v25_v2 = vadd.f32 %v198_v1, %v196_v0  ;;  %s103_s11 = sshll.u32 %s182_s0, 4  ;;  %s104_s11 = int_to_ptr.vmem [resolvable:$true] %s103_s11 }
   0x8   :  { %26 = vadd.xlane.f32.xlu0 %v25_v2 }
  0x7b   :  { %v27_v3 = vpop.xlane.xlu0 %26 }
  0x7c   :  { %v28_v4 = vmul.f32 0.00390625, %v27_v3 }
  0x7e   :  { %v29_v5 = vsub.f32 %v196_v0, %v28_v4  ;;  %v30_v6 = vsub.f32 %v198_v1, %v28_v4 }
  0x80   :  { %v31_v7 = vmul.f32 %v29_v5, %v29_v5  ;;  %v32_v8 = vmul.f32 %v30_v6, %v30_v6 }
  0x82   :  { %v33_v9 = vadd.f32 %v32_v8, %v31_v7 }
  0x84   :  { %34 = vadd.xlane.f32.xlu0 %v33_v9 }
  0xf7   :  { %v35_v10 = vpop.xlane.xlu0 %34 }
  0xf8   :  { %v36_v11 = vmul.f32 0.015686275, %v35_v10 }
  0xfa   :  { %v37_v12 = vadd.f32 0.0004, %v36_v11 }
  0xfc   :  { %119 = vrcp.f32 %v37_v12  ;;  %v49_v16 = vand.u32 2147483648, %v37_v12  ;;  %v47_v18 = vand.u32 2147483647, %v37_v12  ;;  %vm43_vm1 = vweird.f32 %v37_v12 }
  0xfe   :  { %v50_v20 = vor.u32 1.1754944e-38, %v49_v16  ;;  %vm48_vm3 = vcmp.eq.f32.partialorder %v47_v18, 8.507059e+37 }
 0x102   :  { %v120_v13 = vpop.eup %119 }
 0x103   :  { %v39_v14 = vmul.f32 %v120_v13, %v37_v12  ;;  %vm44_vm0 = vweird.f32 %v120_v13 }
 0x104   :  { %vm45_vm2 = vmor %vm43_vm1, %vm44_vm0 }
 0x105   :  { %v40_v15 = vsub.f32 1.0, %v39_v14 }
 0x107   :  { %v41_v17 = vmul.f32 %v120_v13, %v40_v15 }
 0x109   :  { %v42_v19 = vadd.f32 %v120_v13, %v41_v17 }
 0x10b   :  { %v46_v21 = vsel %vm45_vm2, %v120_v13, %v42_v19 }
 0x10c   :  { %v51_v22 = vsel %vm48_vm3, %v50_v20, %v46_v21 }
 0x10d   :  { %v52_v23 = vmul.f32 %v51_v22, %v31_v7  ;;  %v53_v24 = vmul.f32 %v51_v22, %v32_v8 }
 0x10f   :  { %v54_v25 = vadd.f32 0.5, %v52_v23  ;;  %v55_v26 = vadd.f32 0.5, %v53_v24 }
 0x111   :  { %v115_v27 = vmul.f32 -1.442695, %v54_v25  ;;  %v116_v28 = vmul.f32 -1.442695, %v55_v26 }
 0x113   :  { %121 = vpow2.f32 %v115_v27 }
 0x114   :  { %123 = vpow2.f32 %v116_v28 }
 0x119   :  { %v122_v29 = vpop.eup %121 }
 0x11a   :  { %v124_v30 = vpop.eup %123  ;;  %v62_v31 = vadd.f32 1.0, %v122_v29 }
 0x11b   :  { %v63_v32 = vadd.f32 1.0, %v124_v30 }
 0x11c   :  { %125 = vrcp.f32 %v62_v31  ;;  %v75_v38 = vand.u32 2147483648, %v62_v31  ;;  %v73_v41 = vand.u32 2147483647, %v62_v31  ;;  %vm69_vm6 = vweird.f32 %v62_v31 }
 0x11d   :  { %127 = vrcp.f32 %v63_v32  ;;  %v90_v42 = vand.u32 2147483648, %v63_v32  ;;  %v88_v44 = vand.u32 2147483647, %v63_v32  ;;  %vm84_vm8 = vweird.f32 %v63_v32 }
 0x11e   :  { %v76_v46 = vor.u32 1.1754944e-38, %v75_v38  ;;  %vm74_vm9 = vcmp.eq.f32.partialorder %v73_v41, 8.507059e+37 }
 0x11f   :  { %v91_v49 = vor.u32 1.1754944e-38, %v90_v42  ;;  %vm89_vm11 = vcmp.eq.f32.partialorder %v88_v44, 8.507059e+37 }
 0x122   :  { %v126_v33 = vpop.eup %125 }
 0x123   :  { %v128_v34 = vpop.eup %127  ;;  %v65_v35 = vmul.f32 %v126_v33, %v62_v31  ;;  %vm70_vm4 = vweird.f32 %v126_v33 }
 0x124   :  { %v80_v36 = vmul.f32 %v128_v34, %v63_v32  ;;  %vm85_vm5 = vweird.f32 %v128_v34  ;;  %vm71_vm7 = vmor %vm69_vm6, %vm70_vm4 }
 0x125   :  { %v66_v37 = vsub.f32 1.0, %v65_v35  ;;  %vm86_vm10 = vmor %vm84_vm8, %vm85_vm5 }
 0x126   :  { %v81_v39 = vsub.f32 1.0, %v80_v36 }
 0x127   :  { %v67_v40 = vmul.f32 %v126_v33, %v66_v37 }
 0x128   :  { %v82_v43 = vmul.f32 %v128_v34, %v81_v39 }
 0x129   :  { %v68_v45 = vadd.f32 %v126_v33, %v67_v40 }
 0x12a   :  { %v83_v47 = vadd.f32 %v128_v34, %v82_v43 }
 0x12b   :  { %v72_v48 = vsel %vm71_vm7, %v126_v33, %v68_v45 }
 0x12c   :  { %v77_v50 = vsel %vm74_vm9, %v76_v46, %v72_v48  ;;  %v87_v51 = vsel %vm86_vm10, %v128_v34, %v83_v47 }
 0x12d   :  { %v92_v52 = vsel %vm89_vm11, %v91_v49, %v87_v51  ;;  %v94_v53 = vmul.f32 %v77_v50, %v196_v0 }
 0x12e   :  { %v95_v54 = vmul.f32 %v92_v52, %v198_v1 }
 0x12f   :  { %96 = vst [vmem:[#allocation5] sm:$0xff] %v94_v53 }
 0x130   :  { %97 = vst [vmem:[#allocation5 + $0x8] sm:$0xff] %v95_v54 }
 0x131   :  { %108 = dma.vmem_to_hbm [thread:$0]  %s104_s11, 256, %s106_s14, [#allocation4]  }
 0x132   :  { %179 = dma.done.wait [#allocation4], 256  }
 0x133   :  { %180 = vsyncadd [#allocation4], 4294967040 }
 0x134   :  { %113 = vsyncpa [#allocation3], 1 }
 0x135   :  { %114 = vsyncpa [#allocation4], 1 }

</bundles_post_ra>
